<compile_context>
chip_gen: v5e
topology: v5e:2x2
jax: 0.10.0
libtpu: 0.0.40
codegen_flags: <defaults>
</compile_context>

<pallas_src>
import functools

import jax
import jax.numpy as jnp
from jax import lax
from jax.experimental import pallas as pl
from jax.experimental.pallas import tpu as pltpu


def _round_up(x, m):
    return ((x + m - 1) // m) * m


# ---------------------------------------------------------------------------
# Chip configuration (queried once, outside jit).
# ---------------------------------------------------------------------------
@functools.lru_cache(maxsize=1)
def _chip_config():
    """Returns (vmem_capacity_bytes, small_vmem_chip, vmem_limit_bytes)."""
    try:
        cap = pltpu.get_tpu_info().vmem_capacity_bytes
    except Exception:
        cap = 64 << 20                      # conservative fallback (v7x-sized)
    small_vmem = cap <= (64 << 20)          # v7x: 64 MiB VMEM, 2 TCs / chip
    # Leave ~16 MiB headroom for Mosaic internal scratch; cap at 100 MiB on
    # 128 MiB chips (v5e/v6e) -> ~48 MiB on v7x, ~100 MiB on v5e/v6e.
    vmem_limit = max(16 << 20, min(100 << 20, cap - (16 << 20)))
    return cap, small_vmem, int(vmem_limit)


def _pick_tm(n_rows, small_vmem):
    """Row tile: 512 on big-VMEM single-TC chips (v5e/v6e); on v7x keep the
    batch grid at >= 2 'parallel' steps so both TensorCores get work."""
    n16 = _round_up(max(int(n_rows), 1), 16)
    if small_vmem:
        tm = min(256, _round_up(pl.cdiv(n16, 2), 16))   # >= 2 grid steps
    else:
        tm = min(512, n16)
    return max(16, tm)


# ---------------------------------------------------------------------------
# Kernels.
# ---------------------------------------------------------------------------
def _mlp_kernel(x_ref, w1_ref, b1_ref, w2_ref, b2_ref, o_ref):
    # x_ref:  (tm, in_feats)
    # w1_ref: (in_feats, hidden_p)   b1_ref: (1, hidden_p)  f32
    # w2_ref: (hidden_p, out_p)      b2_ref: (1, out_p)     f32
    # o_ref:  (tm, out_p)
    x = x_ref[...]
    h = jnp.dot(x, w1_ref[...], preferred_element_type=jnp.float32)
    h = jnp.maximum(h + b1_ref[...], 0.0)                  # bias + ReLU in f32
    y = jnp.dot(h.astype(w2_ref.dtype), w2_ref[...],
                preferred_element_type=jnp.float32)
    o_ref[...] = (y + b2_ref[...]).astype(o_ref.dtype)


def _mlp_kernel_chunked(x_ref, w1_ref, b1_ref, w2_ref, b2_ref, o_ref, acc_ref,
                        *, chunk, num_chunks):
    # Hidden axis processed in `chunk`-wide slices so the live f32 intermediate
    # is bounded at (tm, chunk); partial products accumulate in a VMEM scratch.
    x = x_ref[...]
    acc_ref[...] = jnp.zeros_like(acc_ref)

    def body(c, carry):
        start = pl.multiple_of(c * chunk, chunk)
        h = jnp.dot(x, w1_ref[:, pl.ds(start, chunk)],
                    preferred_element_type=jnp.float32)
        h = jnp.maximum(h + b1_ref[:, pl.ds(start, chunk)], 0.0)
        acc_ref[...] += jnp.dot(h.astype(w2_ref.dtype),
                                w2_ref[pl.ds(start, chunk), :],
                                preferred_element_type=jnp.float32)
        return carry

    lax.fori_loop(0, num_chunks, body, 0, unroll=(num_chunks <= 8))
    o_ref[...] = (acc_ref[...] + b2_ref[...]).astype(o_ref.dtype)


# ---------------------------------------------------------------------------
# One-time parameter preparation (outside the jitted forward).
# ---------------------------------------------------------------------------
def prepare_mlp_params(w1, b1, w2, b2, *, lane_multiple=256,
                       param_dtype=jnp.bfloat16):
    """Transpose + pad + cast the nn.Linear parameters ONCE.

    w1: (hidden, in_feats)   b1: (hidden,)
    w2: (out_feats, hidden)  b2: (out_feats,)

    hidden / out_feats are padded to multiples of `lane_multiple` (256 ->
    full-width 2x256x256 MXU passes on v6e/v7x; harmless on v5e).  Padding is
    value-preserving: padded hidden columns give ReLU(0+0)=0 and hit zero rows
    of W2; padded output columns are just extra zero(+bias-pad=0) columns.
    """
    hidden, _ = w1.shape
    out_feats = w2.shape[0]
    hidden_p = _round_up(hidden, lane_multiple)
    out_p = _round_up(out_feats, lane_multiple)

    w1_t = jnp.asarray(w1).T                    # (in_feats, hidden)
    w2_t = jnp.asarray(w2).T                    # (hidden, out_feats)
    b1 = jnp.asarray(b1)
    b2 = jnp.asarray(b2)

    if hidden_p != hidden:
        w1_t = jnp.pad(w1_t, ((0, 0), (0, hidden_p - hidden)))
        w2_t = jnp.pad(w2_t, ((0, hidden_p - hidden), (0, 0)))
        b1 = jnp.pad(b1, (0, hidden_p - hidden))
    if out_p != out_feats:
        w2_t = jnp.pad(w2_t, ((0, 0), (0, out_p - out_feats)))
        b2 = jnp.pad(b2, (0, out_p - out_feats))

    return {
        "w1_t": w1_t.astype(param_dtype),                   # (in, hidden_p)
        "b1": b1.reshape(1, hidden_p).astype(jnp.float32),
        "w2_t": w2_t.astype(param_dtype),                   # (hidden_p, out_p)
        "b2": b2.reshape(1, out_p).astype(jnp.float32),
        "out_feats": out_feats,                              # valid output width
    }


# ---------------------------------------------------------------------------
# Fused forward.
# ---------------------------------------------------------------------------
@functools.partial(jax.jit,
                   static_argnames=("tm", "single_buffer", "vmem_limit"))
def _mlp_forward_impl(x, w1_t, b1, w2_t, b2, *, tm, single_buffer, vmem_limit):
    N, in_feats = x.shape
    hidden_p = w1_t.shape[1]
    out_p = w2_t.shape[1]

    grid = (pl.cdiv(N, tm),)

    def const_spec(shape):
        idx = lambda i: (0,) * len(shape)
        if single_buffer:
            # Identical block every grid step -> a second pipeline buffer is
            # pure VMEM waste; keep weights/biases single-buffered.
            return pl.BlockSpec(shape, idx, pipeline_mode=pl.Buffered(1))
        return pl.BlockSpec(shape, idx)

    # Chunk the hidden axis when the full (tm, hidden_p) f32 intermediate would
    # be large (bounds vreg/VMEM pressure; keeps v7x's 64 MiB budget intact).
    if hidden_p > 1024:
        chunk = 512 if hidden_p % 512 == 0 else 256
        kernel = functools.partial(_mlp_kernel_chunked, chunk=chunk,
                                   num_chunks=hidden_p // chunk)
        scratch = [pltpu.VMEM((tm, out_p), jnp.float32)]
    else:
        kernel = _mlp_kernel
        scratch = []

    itemsize = x.dtype.itemsize
    flops = 2 * N * (in_feats * hidden_p + hidden_p * out_p)
    bytes_accessed = (N * in_feats * itemsize
                      + in_feats * hidden_p * w1_t.dtype.itemsize
                      + hidden_p * out_p * w2_t.dtype.itemsize
                      + 4 * (hidden_p + out_p)
                      + N * out_p * itemsize)

    return pl.pallas_call(
        kernel,
        out_shape=jax.ShapeDtypeStruct((N, out_p), x.dtype),
        grid_spec=pltpu.PrefetchScalarGridSpec(
            num_scalar_prefetch=0,
            grid=grid,
            in_specs=[
                pl.BlockSpec((tm, in_feats), lambda i: (i, 0)),   # x row tile
                const_spec((in_feats, hidden_p)),                 # W1^T (resident)
                const_spec((1, hidden_p)),                        # b1
                const_spec((hidden_p, out_p)),                    # W2^T (resident)
                const_spec((1, out_p)),                           # b2
            ],
            out_specs=pl.BlockSpec((tm, out_p), lambda i: (i, 0)),
            scratch_shapes=scratch,
        ),
        compiler_params=pltpu.CompilerParams(
            dimension_semantics=("parallel",),    # megacore / dual-TC on v7x
            vmem_limit_bytes=vmem_limit),
        cost_estimate=pl.CostEstimate(
            flops=flops, transcendentals=0, bytes_accessed=bytes_accessed),
    )(x, w1_t, b1, w2_t, b2)


_SINGLE_BUFFER_OK = None   # lazily probed: does this JAX/libtpu accept Buffered(1)?


def mlp_forward(x, params, *, tm=None):
    """Fused Linear -> ReLU -> Linear.

    Returns the lane-dense PADDED output of shape (N, out_p); the valid width
    is params["out_feats"].  Keeping the padded width avoids paying an extra
    full-HBM-pass slice on every call; slice downstream only if you must.
    """
    global _SINGLE_BUFFER_OK
    _, small_vmem, vmem_limit = _chip_config()
    if tm is None:
        tm = _pick_tm(x.shape[0], small_vmem)

    args = (x, params["w1_t"], params["b1"], params["w2_t"], params["b2"])
    if _SINGLE_BUFFER_OK is None:
        try:
            out = _mlp_forward_impl(*args, tm=tm, single_buffer=True,
                                    vmem_limit=vmem_limit)
            jax.block_until_ready(out)
            _SINGLE_BUFFER_OK = True
            return out
        except Exception:
            # Some JAX/libtpu combos reject pl.Buffered(1) on pallas_call
            # BlockSpecs; fall back to default double-buffered weights.
            _SINGLE_BUFFER_OK = False
    return _mlp_forward_impl(*args, tm=tm, single_buffer=_SINGLE_BUFFER_OK,
                             vmem_limit=vmem_limit)


# ---------------------------------------------------------------------------
# Demo / self-test.
# ---------------------------------------------------------------------------
def init_linear_params(key, in_dim, out_dim, dtype=jnp.float32):
    """Deterministic init mimicking nn.Linear's default U(-1/sqrt(in), 1/sqrt(in))."""
    kw, kb = jax.random.split(key)
    bound = 1.0 / jnp.sqrt(jnp.asarray(in_dim, dtype))
    w = jax.random.uniform(kw, (out_dim, in_dim), dtype, -bound, bound)
    b = jax.random.uniform(kb, (out_dim,), dtype, -bound, bound)
    return w, b


if __name__ == "__main__":
    # Small shapes consistent with MLP(in_feats, hidden_dim, out_feats).
    N, in_feats, hidden_dim, out_feats = 64, 32, 64, 16

    key = jax.random.PRNGKey(0)
    kx, k1, k2 = jax.random.split(key, 3)

    x = jax.random.normal(kx, (N, in_feats), jnp.float32)
    w1, b1 = init_linear_params(k1, in_feats, hidden_dim)   # (hidden, in), (hidden,)
    w2, b2 = init_linear_params(k2, hidden_dim, out_feats)  # (out, hidden), (out,)

    # ONE-TIME layout/dtype/padding prep, outside the jitted forward.
    params = prepare_mlp_params(w1, b1, w2, b2)
    xb = x.astype(jnp.bfloat16)

    out_padded = jax.block_until_ready(mlp_forward(xb, params))
    out = out_padded[:, :params["out_feats"]]    # demo-only un-pad (outside jit)

    # Pure-JAX reference (f32 math on the same bf16-rounded operands).
    w1_t32 = params["w1_t"][:, :hidden_dim].astype(jnp.float32)
    w2_t32 = params["w2_t"][:hidden_dim, :out_feats].astype(jnp.float32)
    ref = jnp.maximum(xb.astype(jnp.float32) @ w1_t32 + b1, 0.0)
    ref = ref @ w2_t32 + b2

    assert out.shape == (N, out_feats)
    assert jnp.allclose(out.astype(jnp.float32), ref, atol=2e-2, rtol=2e-2), \
        "mismatch vs reference"

    print("KERNEL_OK")
</pallas_src>

<mosaic_0001>
module attributes {stable_mosaic.version = 11 : i64} {
  func.func @_mlp_kernel(%arg0: i32, %arg1: memref<32x32xbf16, #tpu.memory_space<vmem>>, %arg2: memref<32x256xbf16, #tpu.memory_space<vmem>>, %arg3: memref<1x256xf32, #tpu.memory_space<vmem>>, %arg4: memref<256x256xbf16, #tpu.memory_space<vmem>>, %arg5: memref<1x256xf32, #tpu.memory_space<vmem>>, %arg6: memref<32x256xbf16, #tpu.memory_space<vmem>>) attributes {dimension_semantics = [#tpu.dimension_semantics<parallel>], iteration_bounds = array<i64: 2>, scalar_prefetch = 0 : i64, scratch_operands = 0 : i64, tpu.core_type = #tpu.core_type<tc>, window_params = [{transform_indices = @transform_0, window_bounds = array<i64: 32, 32>}, {pipeline_mode = #tpu.pipeline_mode<synchronous>, transform_indices = @transform_1, window_bounds = array<i64: 32, 256>}, {pipeline_mode = #tpu.pipeline_mode<synchronous>, transform_indices = @transform_2, window_bounds = array<i64: 1, 256>}, {pipeline_mode = #tpu.pipeline_mode<synchronous>, transform_indices = @transform_3, window_bounds = array<i64: 256, 256>}, {pipeline_mode = #tpu.pipeline_mode<synchronous>, transform_indices = @transform_4, window_bounds = array<i64: 1, 256>}, {transform_indices = @transform_5, window_bounds = array<i64: 32, 256>}]} {
    %c0 = arith.constant 0 : index
    %c0_0 = arith.constant 0 : index
    %0 = vector.load %arg1[%c0, %c0_0] : memref<32x32xbf16, #tpu.memory_space<vmem>>, vector<32x32xbf16>
    %c0_1 = arith.constant 0 : index
    %c0_2 = arith.constant 0 : index
    %1 = vector.load %arg2[%c0_1, %c0_2] : memref<32x256xbf16, #tpu.memory_space<vmem>>, vector<32x256xbf16>
    %cst = arith.constant dense<0.000000e+00> : vector<32x256xf32>
    %2 = tpu.matmul %0, %1, %cst {dimension_numbers = #tpu.dot_dimension_numbers<[1], [0], [0], [1], [0, 0, 1, 1], [], []>} : vector<32x32xbf16>, vector<32x256xbf16>, vector<32x256xf32> -> vector<32x256xf32>
    %c0_3 = arith.constant 0 : index
    %c0_4 = arith.constant 0 : index
    %3 = vector.load %arg3[%c0_3, %c0_4] : memref<1x256xf32, #tpu.memory_space<vmem>>, vector<1x256xf32>
    %4 = vector.broadcast %3 : vector<1x256xf32> to vector<32x256xf32>
    %5 = arith.addf %2, %4 : vector<32x256xf32>
    %cst_5 = arith.constant 0.000000e+00 : f32
    %6 = vector.broadcast %cst_5 : f32 to vector<32x256xf32>
    %7 = arith.maximumf %5, %6 : vector<32x256xf32>
    %8 = arith.truncf %7 : vector<32x256xf32> to vector<32x256xbf16>
    %c0_6 = arith.constant 0 : index
    %c0_7 = arith.constant 0 : index
    %9 = vector.load %arg4[%c0_6, %c0_7] : memref<256x256xbf16, #tpu.memory_space<vmem>>, vector<256x256xbf16>
    %cst_8 = arith.constant dense<0.000000e+00> : vector<32x256xf32>
    %10 = tpu.matmul %8, %9, %cst_8 {dimension_numbers = #tpu.dot_dimension_numbers<[1], [0], [0], [1], [0, 0, 1, 1], [], []>} : vector<32x256xbf16>, vector<256x256xbf16>, vector<32x256xf32> -> vector<32x256xf32>
    %c0_9 = arith.constant 0 : index
    %c0_10 = arith.constant 0 : index
    %11 = vector.load %arg5[%c0_9, %c0_10] : memref<1x256xf32, #tpu.memory_space<vmem>>, vector<1x256xf32>
    %12 = vector.broadcast %11 : vector<1x256xf32> to vector<32x256xf32>
    %13 = arith.addf %10, %12 : vector<32x256xf32>
    %14 = arith.truncf %13 : vector<32x256xf32> to vector<32x256xbf16>
    %c0_11 = arith.constant 0 : index
    %c0_12 = arith.constant 0 : index
    %15 = vector.load %arg6[%c0_11, %c0_12] : memref<32x256xbf16, #tpu.memory_space<vmem>>, vector<32x256xbf16>
    tpu.vector_store %arg6[%c0_11, %c0_12], %14 {strides = array<i32>} : memref<32x256xbf16, #tpu.memory_space<vmem>>, vector<32x256xbf16>,
    return
  }
  func.func @transform_0(%arg0: i32) -> (i32, i32) {
    %c0_i32 = arith.constant 0 : i32
    %c0_i32_0 = arith.constant 0 : i32
    return %arg0, %c0_i32 : i32, i32
  }
  func.func @transform_1(%arg0: i32) -> (i32, i32) {
    %c0_i32 = arith.constant 0 : i32
    %c0_i32_0 = arith.constant 0 : i32
    %c0_i32_1 = arith.constant 0 : i32
    return %c0_i32, %c0_i32_0 : i32, i32
  }
  func.func @transform_2(%arg0: i32) -> (i32, i32) {
    %c0_i32 = arith.constant 0 : i32
    %c0_i32_0 = arith.constant 0 : i32
    %c0_i32_1 = arith.constant 0 : i32
    return %c0_i32, %c0_i32_0 : i32, i32
  }
  func.func @transform_3(%arg0: i32) -> (i32, i32) {
    %c0_i32 = arith.constant 0 : i32
    %c0_i32_0 = arith.constant 0 : i32
    %c0_i32_1 = arith.constant 0 : i32
    return %c0_i32, %c0_i32_0 : i32, i32
  }
  func.func @transform_4(%arg0: i32) -> (i32, i32) {
    %c0_i32 = arith.constant 0 : i32
    %c0_i32_0 = arith.constant 0 : i32
    %c0_i32_1 = arith.constant 0 : i32
    return %c0_i32, %c0_i32_0 : i32, i32
  }
  func.func @transform_5(%arg0: i32) -> (i32, i32) {
    %c0_i32 = arith.constant 0 : i32
    %c0_i32_0 = arith.constant 0 : i32
    return %arg0, %c0_i32 : i32, i32
  }
}

module attributes {stable_mosaic.version = 11 : i64} {
  func.func @_mlp_kernel(%arg0: i32, %arg1: memref<32x32xbf16, #tpu.memory_space<vmem>>, %arg2: memref<32x256xbf16, #tpu.memory_space<vmem>>, %arg3: memref<1x256xf32, #tpu.memory_space<vmem>>, %arg4: memref<256x256xbf16, #tpu.memory_space<vmem>>, %arg5: memref<1x256xf32, #tpu.memory_space<vmem>>, %arg6: memref<32x256xbf16, #tpu.memory_space<vmem>>) attributes {dimension_semantics = [#tpu.dimension_semantics<parallel>], iteration_bounds = array<i64: 2>, scalar_prefetch = 0 : i64, scratch_operands = 0 : i64, tpu.core_type = #tpu.core_type<tc>, window_params = [{transform_indices = @transform_0, window_bounds = array<i64: 32, 32>}, {pipeline_mode = #tpu.pipeline_mode<synchronous>, transform_indices = @transform_1, window_bounds = array<i64: 32, 256>}, {pipeline_mode = #tpu.pipeline_mode<synchronous>, transform_indices = @transform_2, window_bounds = array<i64: 1, 256>}, {pipeline_mode = #tpu.pipeline_mode<synchronous>, transform_indices = @transform_3, window_bounds = array<i64: 256, 256>}, {pipeline_mode = #tpu.pipeline_mode<synchronous>, transform_indices = @transform_4, window_bounds = array<i64: 1, 256>}, {transform_indices = @transform_5, window_bounds = array<i64: 32, 256>}]} {
    %c0 = arith.constant 0 : index
    %c0_0 = arith.constant 0 : index
    %0 = vector.load %arg1[%c0, %c0_0] : memref<32x32xbf16, #tpu.memory_space<vmem>>, vector<32x32xbf16>
    %c0_1 = arith.constant 0 : index
    %c0_2 = arith.constant 0 : index
    %1 = vector.load %arg2[%c0_1, %c0_2] : memref<32x256xbf16, #tpu.memory_space<vmem>>, vector<32x256xbf16>
    %cst = arith.constant dense<0.000000e+00> : vector<32x256xf32>
    %2 = tpu.matmul %0, %1, %cst {dimension_numbers = #tpu.dot_dimension_numbers<[1], [0], [0], [1], [0, 0, 1, 1], [], []>} : vector<32x32xbf16>, vector<32x256xbf16>, vector<32x256xf32> -> vector<32x256xf32>
    %c0_3 = arith.constant 0 : index
    %c0_4 = arith.constant 0 : index
    %3 = vector.load %arg3[%c0_3, %c0_4] : memref<1x256xf32, #tpu.memory_space<vmem>>, vector<1x256xf32>
    %4 = vector.broadcast %3 : vector<1x256xf32> to vector<32x256xf32>
    %5 = arith.addf %2, %4 : vector<32x256xf32>
    %cst_5 = arith.constant 0.000000e+00 : f32
    %6 = vector.broadcast %cst_5 : f32 to vector<32x256xf32>
    %7 = arith.maximumf %5, %6 : vector<32x256xf32>
    %8 = arith.truncf %7 : vector<32x256xf32> to vector<32x256xbf16>
    %c0_6 = arith.constant 0 : index
    %c0_7 = arith.constant 0 : index
    %9 = vector.load %arg4[%c0_6, %c0_7] : memref<256x256xbf16, #tpu.memory_space<vmem>>, vector<256x256xbf16>
    %cst_8 = arith.constant dense<0.000000e+00> : vector<32x256xf32>
    %10 = tpu.matmul %8, %9, %cst_8 {dimension_numbers = #tpu.dot_dimension_numbers<[1], [0], [0], [1], [0, 0, 1, 1], [], []>} : vector<32x256xbf16>, vector<256x256xbf16>, vector<32x256xf32> -> vector<32x256xf32>
    %c0_9 = arith.constant 0 : index
    %c0_10 = arith.constant 0 : index
    %11 = vector.load %arg5[%c0_9, %c0_10] : memref<1x256xf32, #tpu.memory_space<vmem>>, vector<1x256xf32>
    %12 = vector.broadcast %11 : vector<1x256xf32> to vector<32x256xf32>
    %13 = arith.addf %10, %12 : vector<32x256xf32>
    %14 = arith.truncf %13 : vector<32x256xf32> to vector<32x256xbf16>
    %c0_11 = arith.constant 0 : index
    %c0_12 = arith.constant 0 : index
    %15 = vector.load %arg6[%c0_11, %c0_12] : memref<32x256xbf16, #tpu.memory_space<vmem>>, vector<32x256xbf16>
    tpu.vector_store %arg6[%c0_11, %c0_12], %14 {strides = array<i32>} : memref<32x256xbf16, #tpu.memory_space<vmem>>, vector<32x256xbf16>,
    return
  }
  func.func @transform_0(%arg0: i32) -> (i32, i32) {
    %c0_i32 = arith.constant 0 : i32
    %c0_i32_0 = arith.constant 0 : i32
    return %arg0, %c0_i32 : i32, i32
  }
  func.func @transform_1(%arg0: i32) -> (i32, i32) {
    %c0_i32 = arith.constant 0 : i32
    %c0_i32_0 = arith.constant 0 : i32
    %c0_i32_1 = arith.constant 0 : i32
    return %c0_i32, %c0_i32_0 : i32, i32
  }
  func.func @transform_2(%arg0: i32) -> (i32, i32) {
    %c0_i32 = arith.constant 0 : i32
    %c0_i32_0 = arith.constant 0 : i32
    %c0_i32_1 = arith.constant 0 : i32
    return %c0_i32, %c0_i32_0 : i32, i32
  }
  func.func @transform_3(%arg0: i32) -> (i32, i32) {
    %c0_i32 = arith.constant 0 : i32
    %c0_i32_0 = arith.constant 0 : i32
    %c0_i32_1 = arith.constant 0 : i32
    return %c0_i32, %c0_i32_0 : i32, i32
  }
  func.func @transform_4(%arg0: i32) -> (i32, i32) {
    %c0_i32 = arith.constant 0 : i32
    %c0_i32_0 = arith.constant 0 : i32
    %c0_i32_1 = arith.constant 0 : i32
    return %c0_i32, %c0_i32_0 : i32, i32
  }
  func.func @transform_5(%arg0: i32) -> (i32, i32) {
    %c0_i32 = arith.constant 0 : i32
    %c0_i32_0 = arith.constant 0 : i32
    return %arg0, %c0_i32 : i32, i32
  }
}

</mosaic_0001>

<bundles_post_ra>
// kernel: _mlp_forward_impl.1
= control target key start
LH: loop header
LB: loop body
LE: loop exit
PB: predicated region body
PF: predicated region fallthrough
CT: control target
= control target key end

     0   :  { %10 = vsyncpa [#allocation3], 0  ;;  %s1259_s0 = inlined_call_operand.vmem [shape: bf16[64,32], index: 0, kind: input, shape index: {}]   ;;  %s1260_s1 = inlined_call_operand.vmem [shape: bf16[32,256], index: 1, kind: input, shape index: {}]   ;;  %s1261_s2 = inlined_call_operand.vmem [shape: f32[1,256], index: 2, kind: input, shape index: {}]   ;;  %s1262_s3 = inlined_call_operand.hbm [shape: bf16[256,256], index: 3, kind: input, shape index: {}]   ;;  %s1263_s4 = inlined_call_operand.vmem [shape: f32[1,256], index: 4, kind: input, shape index: {}]   ;;  %s1264_s5 = inlined_call_operand.hbm [shape: bf16[64,256], index: 5, kind: output, shape index: {}]  }
   0x1   :  { %11 = vsyncpa [#allocation4], 0 }
   0x2   :  { %13 = vsyncpa [#allocation4 + $0x1], 0  ;;  %s1116_s18 = smov 0   ;;  %s1118_s19 = smov 0  }
   0x3   :  { %s1120_s20 = smov 0   ;;  %s1122_s21 = smov 0  }
   0x4 LB: > { %s1137_s22 = sadd.s32 4294967295, %s1079_s21   ;;  %s718_s23 = sadd.s32 4294967294, %s1079_s21   ;;  %s1079_s21 = sphi %s1122_s21, %s1270_s21   ;;  %s1075_s20 = sphi %s1120_s20, %s1269_s20   ;;  %s1071_s19 = sphi %s1118_s19, %s1268_s19   ;;  %s1067_s18 = sphi %s1116_s18, %s1267_s18  }
   0x5   : > { %s1141_s24 = sadd.s32 1, %s1079_s21   ;;  %s136_s25 = sadd.s32 1, %s1075_s20 }
   0x6   : > { %s133_s26 = ssub.s32 %s1079_s21, %s1141_s24  ;;  %p146_p0 = scmp.ne.s32.totalorder %s1075_s20, %s1071_s19 }
   0x7   : > { %p134_p1 = scmp.eq.s32.totalorder %s133_s26, 0  ;;  %p147_p2 = scmp.eq.s32.totalorder %s1137_s22, 1 }
   0x8   : > { %p152_p3 = scmp.ne.s32.totalorder %s1071_s19, %s1067_s18  ;;  %p153_p4 = scmp.eq.s32.totalorder %s718_s23, 1 }
   0x9   : > { %s1152_s27 = scalar_select %p134_p1, %s1075_s20, %s136_s25  }
   0xa   : > { %p1154_p5 = por %p147_p2, %p146_p0  ;;  %p1158_p6 = por %p153_p4, %p152_p3 }
   0xb   : > { %p719_p7 = scmp.ge.s32.totalorder %s1079_s21, 1  ;;  %p160_p8 = scmp.lt.s32.totalorder %s1079_s21, 3 }
   0xc   : > { %p943_p9 = scmp.eq.s32.totalorder %s1137_s22, 0  ;;  %s177_s7 = sshll.u32 %s1262_s3, 4  ;;  %s178_s7 = int_to_ptr.hbm [resolvable:$true] %s177_s7 }
   0xd   : > { %p161_p10 = pnand %p719_p7, %p160_p8  ;;  %s1081_s8 = smov [#allocation2]  }
   0xe   : > { %s179_s9 = sshll.u32 %s1081_s8, 4  ;;  %s1082_s10 = smov 128   ;;  %s180_s9 = int_to_ptr.vmem [resolvable:$true] %s179_s9 }
   0xf   : > { %p935_p11 = pneg %p161_p10  ;;  %s1083_s11 = smov 8  }
  0x10   : > { %207 = sbr.rel (%p161_p10) target bundleno = 339 (0x153), region = 40 }
  0x11   : > { %p936_p12 = pnand %p943_p9, %p935_p11 }
  0x13   : > { %938 = dma.hbm_to_vmem [thread:$0]  (!%p936_p12), %s178_s7, 4096, %s180_s9, [#allocation3], %s1082_s10, %s1082_s10, %s1083_s11  }
  0x15   : > { %1058 = dma.done.wait (%p943_p9), [#allocation3], 4096  }
  0x16   : > { %1060 = vsyncadd (%p943_p9), [#allocation3], 4294963200  ;;  %s725_s12 = sshll.u32 %s1137_s22, 2  ;;  %v745_v0 = vld [vmem:[%s1260_s1 + $0x10] sm:$0xf]  ;;  %vm288_vm0 = vcmask 261120  }
  0x17   : > { %p237_p13 = scmp.lt.s32.totalorder %s725_s12, 7  ;;  %v894_v1 = vld [vmem:[%s1260_s1 + $0x14] sm:$0xf0]  ;;  %v893_v2 = vld [vmem:[%s1260_s1 + $0x14] sm:$0xf]  ;;  %s233_s30 = sand.u32 1, %s1071_s19  }
  0x18   : > { %v746_v3 = vor.u32 %v894_v1, %v745_v0  ;;  %v747_v4 = vld [vmem:[%s1260_s1 + $0x18] sm:$0xf0]  ;;  %v737_v5 = vld [vmem:[%s1260_s1] sm:$0xf]  ;;  %v892_v6 = vld [vmem:[%s1260_s1 + $0x4] sm:$0xf0] }
  0x19   : > { %s1272_s12 = smov (!%p237_p13, %s725_s12), 7  ;;  %v750_v7 = vor.u32 %v893_v2, %v747_v4  ;;  %v891_v8 = vld [vmem:[%s1260_s1 + $0x4] sm:$0xf]  ;;  %v739_v9 = vld [vmem:[%s1260_s1 + $0x8] sm:$0xf0]  ;;  %v738_v10 = vor.u32 %v892_v6, %v737_v5  ;;  %s724_s6 = sshll.u32 %s233_s30, 5 }
  0x1a   : > { %s726_s13 = sshll.u32 %s1272_s12, 2  ;;  %301 = vmatpush.bf16.msra.mxu0 %v746_v3  ;;  %v813_v11 = vld [vmem:[#allocation2 + $0x70] sm:$0xf]  ;;  %v910_v12 = vld [vmem:[#allocation2 + $0x74] sm:$0xf0]  ;;  %v742_v13 = vor.u32 %v891_v8, %v739_v9  ;;  %s1219_s7 = scalar_lea.vmem [#allocation5], %s724_s6 }
  0x1b   : > { %s1196_s12 = scalar_lea.vmem %s1259_s0, %s726_s13  ;;  %320 = vmatpush.bf16.msra.mxu1 %v750_v7  ;;  %v814_v15 = vor.u32 %v910_v12, %v813_v11  ;;  %v877_v16 = vld [vmem:[#allocation2 + $0xf0] sm:$0xf]  ;;  %v926_v17 = vld [vmem:[#allocation2 + $0xf4] sm:$0xf0]  ;;  %v909_v18 = vld [vmem:[#allocation2 + $0x74] sm:$0xf] }
  0x1c   : > { %v889_v14 = vld [vmem:[%s1196_s12] sm:$0xff]  ;;  %v878_v19 = vor.u32 %v926_v17, %v877_v16  ;;  %v815_v20 = vld [vmem:[#allocation2 + $0x78] sm:$0xf0]  ;;  %v925_v21 = vld [vmem:[#allocation2 + $0xf4] sm:$0xf]  ;;  %s928_s8 = sshll.u32 %s1137_s22, 5 }
  0x1d   : > { %v879_v22 = vld [vmem:[#allocation2 + $0xf8] sm:$0xf0]  ;;  %543 = vmatpush.bf16.msra.mxu2 %v814_v15  ;;  %v818_v23 = vor.u32 %v909_v18, %v815_v20  ;;  %v805_v25 = vld [vmem:[#allocation2 + $0x60] sm:$0xf]  ;;  %v908_v26 = vld [vmem:[#allocation2 + $0x64] sm:$0xf0]  ;;  %s640_s11 = scalar_lea.hbm %s1264_s5, %s928_s8 }
  0x1e   : > { %v882_v24 = vor.u32 %v925_v21, %v879_v22  ;;  %v869_v27 = vld [vmem:[#allocation2 + $0xe0] sm:$0xf]  ;;  %302 = vmatpush.bf16.msra.mxu0 %v738_v10  ;;  %562 = vmatpush.bf16.msra.mxu3 %v878_v19  ;;  %v806_v28 = vor.u32 %v908_v26, %v805_v25  ;;  %v924_v29 = vld [vmem:[#allocation2 + $0xe4] sm:$0xf0]  ;;  %v907_v30 = vld [vmem:[#allocation2 + $0x64] sm:$0xf] }
  0x1f   : > { %v807_v31 = vld [vmem:[#allocation2 + $0x68] sm:$0xf0]  ;;  %321 = vmatpush.bf16.msra.mxu1 %v742_v13  ;;  %v870_v32 = vor.u32 %v924_v29, %v869_v27  ;;  %v923_v34 = vld [vmem:[#allocation2 + $0xe4] sm:$0xf]  ;;  %v797_v36 = vld [vmem:[#allocation2 + $0x50] sm:$0xf] }
  0x20   : > { %v810_v33 = vor.u32 %v907_v30, %v807_v31  ;;  %v871_v35 = vld [vmem:[#allocation2 + $0xe8] sm:$0xf0]  ;;  %v906_v38 = vld [vmem:[#allocation2 + $0x54] sm:$0xf0]  ;;  %v861_v39 = vld [vmem:[#allocation2 + $0xd0] sm:$0xf] }
  0x21   : > { %v874_v37 = vor.u32 %v923_v34, %v871_v35  ;;  %v922_v40 = vld [vmem:[#allocation2 + $0xd4] sm:$0xf0]  ;;  %751 = vmatmul.msk.bf16.vlgmr.msra.gmra.mxu0 %vm288_vm0, %v889_v14  ;;  %544 = vmatpush.bf16.msra.mxu2 %v806_v28  ;;  %v798_v41 = vor.u32 %v906_v38, %v797_v36  ;;  %v905_v42 = vld [vmem:[#allocation2 + $0x54] sm:$0xf]  ;;  %v799_v43 = vld [vmem:[#allocation2 + $0x58] sm:$0xf0] }
  0x22   : > { %581 = vmatpush.bf16.msrb.mxu0 %v818_v23  ;;  %v921_v44 = vld [vmem:[#allocation2 + $0xd4] sm:$0xf]  ;;  %753 = vmatmul.msk.bf16.vlgmr.msra.gmra.mxu1 %vm288_vm0, %v889_v14  ;;  %v862_v45 = vor.u32 %v922_v40, %v861_v39  ;;  %v863_v46 = vld [vmem:[#allocation2 + $0xd8] sm:$0xf0]  ;;  %v789_v47 = vld [vmem:[#allocation2 + $0x40] sm:$0xf]  ;;  %v802_v49 = vor.u32 %v905_v42, %v799_v43 }
  0x23   : > { %600 = vmatpush.bf16.msrb.mxu1 %v882_v24  ;;  %563 = vmatpush.bf16.msra.mxu3 %v870_v32  ;;  %v904_v48 = vld [vmem:[#allocation2 + $0x44] sm:$0xf0]  ;;  %v853_v50 = vld [vmem:[#allocation2 + $0xc0] sm:$0xf]  ;;  %v866_v52 = vor.u32 %v921_v44, %v863_v46  ;;  %v903_v53 = vld [vmem:[#allocation2 + $0x44] sm:$0xf] }
  0x24   : > { %v920_v51 = vld [vmem:[#allocation2 + $0xc4] sm:$0xf0]  ;;  %v791_v54 = vld [vmem:[#allocation2 + $0x48] sm:$0xf0]  ;;  %v790_v55 = vor.u32 %v904_v48, %v789_v47  ;;  %v919_v56 = vld [vmem:[#allocation2 + $0xc4] sm:$0xf] }
  0x25   : > { %545 = vmatpush.bf16.msra.mxu2 %v798_v41  ;;  %v855_v57 = vld [vmem:[#allocation2 + $0xc8] sm:$0xf0]  ;;  %v854_v58 = vor.u32 %v920_v51, %v853_v50  ;;  %v794_v59 = vor.u32 %v903_v53, %v791_v54  ;;  %v781_v62 = vld [vmem:[#allocation2 + $0x30] sm:$0xf]  ;;  %v902_v63 = vld [vmem:[#allocation2 + $0x34] sm:$0xf0] }
  0x26   : > { %582 = vmatpush.bf16.msrb.mxu0 %v810_v33  ;;  %v858_v60 = vor.u32 %v919_v56, %v855_v57  ;;  %v890_v61 = vld [vmem:[%s1196_s12 + $0x8] sm:$0xff]  ;;  %v845_v0 = vld [vmem:[#allocation2 + $0xb0] sm:$0xf]  ;;  %v782_v1 = vor.u32 %v902_v63, %v781_v62  ;;  %v918_v2 = vld [vmem:[#allocation2 + $0xb4] sm:$0xf0]  ;;  %s641_s12 = sshll.u32 %s1219_s7, 4  ;;  %s642_s12 = int_to_ptr.vmem [resolvable:$true] %s641_s12 }
  0x27   : > { %601 = vmatpush.bf16.msrb.mxu1 %v874_v37  ;;  %564 = vmatpush.bf16.msra.mxu3 %v862_v45  ;;  %v901_v3 = vld [vmem:[#allocation2 + $0x34] sm:$0xf]  ;;  %v783_v4 = vld [vmem:[#allocation2 + $0x38] sm:$0xf0]  ;;  %v846_v5 = vor.u32 %v918_v2, %v845_v0  ;;  %v773_v10 = vld [vmem:[#allocation2 + $0x20] sm:$0xf] }
  0x28   : > { %v786_v6 = vor.u32 %v901_v3, %v783_v4  ;;  %v917_v7 = vld [vmem:[#allocation2 + $0xb4] sm:$0xf]  ;;  %v847_v8 = vld [vmem:[#allocation2 + $0xb8] sm:$0xf0]  ;;  %v900_v11 = vld [vmem:[#allocation2 + $0x24] sm:$0xf0] }
  0x29   : > { %546 = vmatpush.bf16.msra.mxu2 %v790_v55  ;;  %v850_v9 = vor.u32 %v917_v7, %v847_v8  ;;  %v774_v12 = vor.u32 %v900_v11, %v773_v10  ;;  %v837_v13 = vld [vmem:[#allocation2 + $0xa0] sm:$0xf]  ;;  %v916_v14 = vld [vmem:[#allocation2 + $0xa4] sm:$0xf0]  ;;  %v899_v15 = vld [vmem:[#allocation2 + $0x24] sm:$0xf] }
  0x2a   : > { %583 = vmatpush.bf16.msrb.mxu0 %v802_v49  ;;  %v838_v16 = vor.u32 %v916_v14, %v837_v13  ;;  %v775_v17 = vld [vmem:[#allocation2 + $0x28] sm:$0xf0]  ;;  %v915_v18 = vld [vmem:[#allocation2 + $0xa4] sm:$0xf]  ;;  %v765_v22 = vld [vmem:[#allocation2 + $0x10] sm:$0xf] }
  0x2b   : > { %602 = vmatpush.bf16.msrb.mxu1 %v866_v52  ;;  %565 = vmatpush.bf16.msra.mxu3 %v854_v58  ;;  %v839_v19 = vld [vmem:[#allocation2 + $0xa8] sm:$0xf0]  ;;  %v778_v20 = vor.u32 %v899_v15, %v775_v17  ;;  %v898_v23 = vld [vmem:[#allocation2 + $0x14] sm:$0xf0]  ;;  %v829_v24 = vld [vmem:[#allocation2 + $0x90] sm:$0xf] }
  0x2c   : > { %v842_v21 = vor.u32 %v915_v18, %v839_v19  ;;  %v766_v25 = vor.u32 %v898_v23, %v765_v22  ;;  %v914_v26 = vld [vmem:[#allocation2 + $0x94] sm:$0xf0]  ;;  %v897_v27 = vld [vmem:[#allocation2 + $0x14] sm:$0xf]  ;;  %v767_v28 = vld [vmem:[#allocation2 + $0x18] sm:$0xf0] }
  0x2d   : > { %547 = vmatpush.bf16.msra.mxu2 %v782_v1  ;;  %v830_v29 = vor.u32 %v914_v26, %v829_v24  ;;  %v770_v30 = vor.u32 %v897_v27, %v767_v28  ;;  %v913_v31 = vld [vmem:[#allocation2 + $0x94] sm:$0xf]  ;;  %v831_v32 = vld [vmem:[#allocation2 + $0x98] sm:$0xf0]  ;;  %v757_v34 = vld [vmem:[#allocation2] sm:$0xf] }
  0x2e   : > { %584 = vmatpush.bf16.msrb.mxu0 %v794_v59  ;;  %v834_v33 = vor.u32 %v913_v31, %v831_v32  ;;  %v896_v35 = vld [vmem:[#allocation2 + $0x4] sm:$0xf0]  ;;  %v821_v36 = vld [vmem:[#allocation2 + $0x80] sm:$0xf]  ;;  %v895_v39 = vld [vmem:[#allocation2 + $0x4] sm:$0xf] }
  0x2f   : > { %603 = vmatpush.bf16.msrb.mxu1 %v858_v60  ;;  %566 = vmatpush.bf16.msra.mxu3 %v846_v5  ;;  %v758_v37 = vor.u32 %v896_v35, %v757_v34  ;;  %v912_v38 = vld [vmem:[#allocation2 + $0x84] sm:$0xf0]  ;;  %v759_v40 = vld [vmem:[#allocation2 + $0x8] sm:$0xf0]  ;;  %v911_v43 = vld [vmem:[#allocation2 + $0x84] sm:$0xf] }
  0x30   : > { %v822_v41 = vor.u32 %v912_v38, %v821_v36  ;;  %v762_v42 = vor.u32 %v895_v39, %v759_v40  ;;  %v823_v44 = vld [vmem:[#allocation2 + $0x88] sm:$0xf0]  ;;  %v252_v46 = vld [vmem:[%s1261_s2] sm:$0x3]  ;;  %s643_s14 = sshll.u32 %s640_s11, 4  ;;  %s628_s22 = scalar_lea.sflag [#allocation4], %s233_s30  ;;  %s644_s14 = int_to_ptr.hbm [resolvable:$true] %s643_s14 }
  0x31   : > { %752 = vmatmul.msk.bf16.gmra.mxu0 %vm288_vm0, %v890_v61  ;;  %548 = vmatpush.bf16.msra.mxu2 %v774_v12  ;;  %v826_v45 = vor.u32 %v911_v43, %v823_v44  ;;  %v254_v49 = vperm.slane %v252_v46, 0  ;;  %v255_v50 = vperm.slane %v252_v46, 1  ;;  %v377_v13 = vld [vmem:[%s1263_s4] sm:$0x3]  ;;  %s1027_s15 = sshra.s32 %s644_s14, 4  ;;  %s1033_s23 = scalar_lea.hbm %s1264_s5, 64  ;;  %s1028_s15 = int_to_ptr.hbm [resolvable:$true] %s1027_s15 }
  0x32   : > { %754 = vmatmul.msk.bf16.gmra.mxu1 %vm288_vm0, %v890_v61  ;;  %585 = vmatpush.bf16.msrb.mxu0 %v786_v6  ;;  %v380_v15 = vperm.slane %v377_v13, 1  ;;  %v379_v17 = vperm.slane %v377_v13, 0  ;;  %s1029_s16 = scalar_lea.hbm %s1028_s15, 32  ;;  %p1034_p3 = scmp.lt.s32.totalorder %s1028_s15, %s1264_s5 }
  0x33   : > { %604 = vmatpush.bf16.msrb.mxu1 %v850_v9  ;;  %567 = vmatpush.bf16.msra.mxu3 %v838_v16  ;;  %p1030_p0 = scmp.ne.s32.totalorder %s1028_s15, %s1029_s16  ;;  %p1035_p4 = scmp.lt.s32.totalorder %s1033_s23, %s1029_s16 }
  0x35   : > { %549 = vmatpush.bf16.msra.mxu2 %v766_v25  ;;  %p1031_p1 = pnand %p1030_p0, %p1154_p5  ;;  %p1036_p7 = por %p1035_p4, %p1034_p3 }
  0x36   : > { %586 = vmatpush.bf16.msrb.mxu0 %v778_v20 }
  0x37   : > { %605 = vmatpush.bf16.msrb.mxu1 %v842_v21  ;;  %568 = vmatpush.bf16.msra.mxu3 %v830_v29  ;;  %p1032_p2 = pneg %p1031_p1 }
  0x39   : > { %550 = vmatpush.bf16.msra.mxu2 %v758_v37  ;;  %p1037_p8 = pnand %p1036_p7, %p1032_p2 }
  0x3a   : > { %587 = vmatpush.bf16.msrb.mxu0 %v770_v30 }
  0x3b   : > { %606 = vmatpush.bf16.msrb.mxu1 %v834_v33  ;;  %569 = vmatpush.bf16.msra.mxu3 %v822_v41 }
  0x3e   : > { %588 = vmatpush.bf16.msrb.mxu0 %v762_v42 }
  0x3f   : > { %607 = vmatpush.bf16.msrb.mxu1 %v826_v45 }
  0x9e   : > { %v304_v47 = vpop.f32.mrf.mxu0 }
  0x9f   : > { %v323_v48 = vpop.f32.mrf.mxu1  ;;  %v305_v51 = vadd.f32 %v304_v47, %v254_v49 }
  0xa0   : > { %v324_v52 = vadd.f32 %v323_v48, %v255_v50 }
  0xa1   : > { %v333_v57 = vmax.f32 %v305_v51, 0.0 }
  0xa2   : > { %v334_v59 = vmax.f32 %v324_v52, 0.0 }
  0xa6   : > { %v306_v53 = vpop.f32.mrf.mxu0 }
  0xa7   : > { %v307_v54 = vadd.f32 %v306_v53, %v254_v49  ;;  %v325_v55 = vpop.f32.mrf.mxu1 }
  0xa8   : > { %v326_v56 = vadd.f32 %v325_v55, %v255_v50 }
  0xa9   : > { %v335_v58 = vmax.f32 %v307_v54, 0.0 }
  0xaa   : > { %v336_v60 = vmax.f32 %v326_v56, 0.0 }
  0xab   : > { %v341_v61 = vpack.c.bf16 %v335_v58, %v333_v57 }
  0xac   : > { %v342_v62 = vpack.c.bf16 %v336_v60, %v334_v59 }
  0xad   : > { %551 = vmatmul.bf16.vlgmr.msra.gmra.mxu2 %v341_v61  ;;  %589 = vmatmul.bf16.vlgmr.msrb.gmra.mxu0 %v341_v61 }
  0xae   : > { %570 = vmatmul.bf16.vlgmr.msra.gmra.mxu3 %v342_v62  ;;  %608 = vmatmul.bf16.vlgmr.msrb.gmra.mxu1 %v342_v62  ;;  %v309_v63 = vpop.f32.mrf.mxu0 }
  0xaf   : > { %v328_v0 = vpop.f32.mrf.mxu1  ;;  %v310_v1 = vadd.f32 %v309_v63, %v254_v49 }
  0xb0   : > { %v329_v2 = vadd.f32 %v328_v0, %v255_v50 }
  0xb1   : > { %v337_v7 = vmax.f32 %v310_v1, 0.0 }
  0xb2   : > { %v338_v9 = vmax.f32 %v329_v2, 0.0 }
  0xb6   : > { %v311_v3 = vpop.f32.mrf.mxu0 }
  0xb7   : > { %v312_v4 = vadd.f32 %v311_v3, %v254_v49  ;;  %v330_v5 = vpop.f32.mrf.mxu1 }
  0xb8   : > { %v331_v6 = vadd.f32 %v330_v5, %v255_v50 }
  0xb9   : > { %v339_v8 = vmax.f32 %v312_v4, 0.0 }
  0xba   : > { %v340_v10 = vmax.f32 %v331_v6, 0.0 }
  0xbb   : > { %v343_v11 = vpack.c.bf16 %v339_v8, %v337_v7 }
  0xbc   : > { %v344_v12 = vpack.c.bf16 %v340_v10, %v338_v9 }
  0xbd   : > { %556 = vmatmul.bf16.gmra.mxu2 %v343_v11  ;;  %594 = vmatmul.bf16.gmra.mxu0 %v343_v11 }
  0xbe   : > { %575 = vmatmul.bf16.gmra.mxu3 %v344_v12  ;;  %613 = vmatmul.bf16.gmra.mxu1 %v344_v12 }
 0x12a   : > { %v590_v14 = vpop.f32.mrf.mxu0 }
 0x12b   : > { %v609_v16 = vpop.f32.mrf.mxu1  ;;  %v591_v18 = vadd.f32 %v590_v14, %v380_v15 }
 0x12d   : > { %v610_v23 = vadd.f32 %v609_v16, %v591_v18 }
 0x130   : > { %v552_v19 = vpop.f32.mrf.mxu2 }
 0x131   : > { %v553_v20 = vadd.f32 %v552_v19, %v379_v17  ;;  %v571_v21 = vpop.f32.mrf.mxu3 }
 0x132   : > { %v592_v22 = vpop.f32.mrf.mxu0 }
 0x133   : > { %v572_v24 = vadd.f32 %v571_v21, %v553_v20  ;;  %v611_v26 = vpop.f32.mrf.mxu1  ;;  %v593_v27 = vadd.f32 %v592_v22, %v380_v15 }
 0x135   : > { %v619_v25 = vpack.c.bf16 %v610_v23, %v572_v24  ;;  %v612_v32 = vadd.f32 %v611_v26, %v593_v27 }
 0x137   : > { %623 = vst [vmem:[%s1219_s7] sm:$0xff] %v619_v25 }
 0x138   : > { %v554_v28 = vpop.f32.mrf.mxu2 }
 0x139   : > { %v555_v29 = vadd.f32 %v554_v28, %v379_v17  ;;  %v573_v30 = vpop.f32.mrf.mxu3 }
 0x13a   : > { %v595_v31 = vpop.f32.mrf.mxu0 }
 0x13b   : > { %v574_v33 = vadd.f32 %v573_v30, %v555_v29  ;;  %v596_v35 = vadd.f32 %v595_v31, %v380_v15  ;;  %v614_v36 = vpop.f32.mrf.mxu1 }
 0x13d   : > { %v620_v34 = vpack.c.bf16 %v612_v32, %v574_v33  ;;  %v615_v40 = vadd.f32 %v614_v36, %v596_v35 }
 0x13f   : > { %624 = vst [vmem:[%s1219_s7 + $0x8] sm:$0xff] %v620_v34 }
 0x140   : > { %v557_v37 = vpop.f32.mrf.mxu2 }
 0x141   : > { %v558_v38 = vadd.f32 %v557_v37, %v379_v17  ;;  %v576_v39 = vpop.f32.mrf.mxu3 }
 0x142   : > { %v597_v42 = vpop.f32.mrf.mxu0 }
 0x143   : > { %v577_v41 = vadd.f32 %v576_v39, %v558_v38  ;;  %v598_v44 = vadd.f32 %v597_v42, %v380_v15  ;;  %v616_v47 = vpop.f32.mrf.mxu1 }
 0x145   : > { %v621_v43 = vpack.c.bf16 %v615_v40, %v577_v41  ;;  %v617_v49 = vadd.f32 %v616_v47, %v598_v44 }
 0x147   : > { %625 = vst [vmem:[%s1219_s7 + $0x10] sm:$0xff] %v621_v43 }
 0x148   : > { %v559_v45 = vpop.f32.mrf.mxu2 }
 0x149   : > { %v560_v46 = vadd.f32 %v559_v45, %v379_v17  ;;  %v578_v48 = vpop.f32.mrf.mxu3 }
 0x14b   : > { %v579_v50 = vadd.f32 %v578_v48, %v560_v46 }
 0x14d   : > { %v622_v51 = vpack.c.bf16 %v617_v49, %v579_v50 }
 0x14f   : > { %626 = vst [vmem:[%s1219_s7 + $0x18] sm:$0xff] %v622_v51 }
 0x150   : > { %1040 = shalt.err (!%p1037_p8)
}
 0x151   : > { %s1084_s30 = smov 128   ;;  %s1085_s6 = smov 8  }
 0x152   : > { %933 = dma.vmem_to_hbm [thread:$0]  (%p1154_p5), %s642_s12, 512, %s644_s14, %s628_s22, %s1084_s30, %s1084_s30, %s1085_s6  }
 0x153 PF: > { %p945_p9 = scmp.ge.s32.totalorder %s1079_s21, 2  ;;  %s658_s7 = sand.u32 1, %s1067_s18  }
 0x154   : > { %s659_s8 = scalar_lea.sflag [#allocation4], %s658_s7 }
 0x155   : > { %p940_p10 = pnand %p945_p9, %p1158_p6 }
 0x157   : > { %p941_p11 = pneg %p940_p10 }
 0x159   : > { %1062 = dma.done.wait (%p941_p11), %s659_s8, 512  }
 0x15a   : > { %1064 = vsyncadd (%p941_p11), %s659_s8, 4294966784  ;;  %p16_p12 = scmp.ge.s32.totalorder %s1141_s24, 4   ;;  %s1267_s18 = smov %s1071_s19 }
 0x15b   : > { %s1268_s19 = smov %s1075_s20  ;;  %s1269_s20 = smov %s1152_s27 }
 0x15c   : > { %s1270_s21 = smov %s1141_s24  ;;  %18 = sbr.rel (!%p16_p12) target bundleno = 4 (0x4), region = 80 }
 0x161   :  { %665 = vsyncpa [#allocation3], 1 }
 0x162   :  { %667 = vsyncpa [#allocation3 + $0x1], 1 }
 0x163   :  { %668 = vsyncpa [#allocation4], 1 }
 0x164   :  { %670 = vsyncpa [#allocation4 + $0x1], 1 }

// kernel: _mlp_forward_impl.1
= control target key start
LH: loop header
LB: loop body
LE: loop exit
PB: predicated region body
PF: predicated region fallthrough
CT: control target
= control target key end

     0   :  { %10 = vsyncpa [#allocation3], 0  ;;  %s1259_s0 = inlined_call_operand.vmem [shape: bf16[64,32], index: 0, kind: input, shape index: {}]   ;;  %s1260_s1 = inlined_call_operand.vmem [shape: bf16[32,256], index: 1, kind: input, shape index: {}]   ;;  %s1261_s2 = inlined_call_operand.vmem [shape: f32[1,256], index: 2, kind: input, shape index: {}]   ;;  %s1262_s3 = inlined_call_operand.hbm [shape: bf16[256,256], index: 3, kind: input, shape index: {}]   ;;  %s1263_s4 = inlined_call_operand.vmem [shape: f32[1,256], index: 4, kind: input, shape index: {}]   ;;  %s1264_s5 = inlined_call_operand.hbm [shape: bf16[64,256], index: 5, kind: output, shape index: {}]  }
   0x1   :  { %11 = vsyncpa [#allocation4], 0 }
   0x2   :  { %13 = vsyncpa [#allocation4 + $0x1], 0  ;;  %s1116_s18 = smov 0   ;;  %s1118_s19 = smov 0  }
   0x3   :  { %s1120_s20 = smov 0   ;;  %s1122_s21 = smov 0  }
   0x4 LB: > { %s1137_s22 = sadd.s32 4294967295, %s1079_s21   ;;  %s718_s23 = sadd.s32 4294967294, %s1079_s21   ;;  %s1079_s21 = sphi %s1122_s21, %s1270_s21   ;;  %s1075_s20 = sphi %s1120_s20, %s1269_s20   ;;  %s1071_s19 = sphi %s1118_s19, %s1268_s19   ;;  %s1067_s18 = sphi %s1116_s18, %s1267_s18  }
   0x5   : > { %s1141_s24 = sadd.s32 1, %s1079_s21   ;;  %s136_s25 = sadd.s32 1, %s1075_s20 }
   0x6   : > { %s133_s26 = ssub.s32 %s1079_s21, %s1141_s24  ;;  %p146_p0 = scmp.ne.s32.totalorder %s1075_s20, %s1071_s19 }
   0x7   : > { %p134_p1 = scmp.eq.s32.totalorder %s133_s26, 0  ;;  %p147_p2 = scmp.eq.s32.totalorder %s1137_s22, 1 }
   0x8   : > { %p152_p3 = scmp.ne.s32.totalorder %s1071_s19, %s1067_s18  ;;  %p153_p4 = scmp.eq.s32.totalorder %s718_s23, 1 }
   0x9   : > { %s1152_s27 = scalar_select %p134_p1, %s1075_s20, %s136_s25  }
   0xa   : > { %p1154_p5 = por %p147_p2, %p146_p0  ;;  %p1158_p6 = por %p153_p4, %p152_p3 }
   0xb   : > { %p719_p7 = scmp.ge.s32.totalorder %s1079_s21, 1  ;;  %p160_p8 = scmp.lt.s32.totalorder %s1079_s21, 3 }
   0xc   : > { %p943_p9 = scmp.eq.s32.totalorder %s1137_s22, 0  ;;  %s177_s7 = sshll.u32 %s1262_s3, 4  ;;  %s178_s7 = int_to_ptr.hbm [resolvable:$true] %s177_s7 }
   0xd   : > { %p161_p10 = pnand %p719_p7, %p160_p8  ;;  %s1081_s8 = smov [#allocation2]  }
   0xe   : > { %s179_s9 = sshll.u32 %s1081_s8, 4  ;;  %s1082_s10 = smov 128   ;;  %s180_s9 = int_to_ptr.vmem [resolvable:$true] %s179_s9 }
   0xf   : > { %p935_p11 = pneg %p161_p10  ;;  %s1083_s11 = smov 8  }
  0x10   : > { %207 = sbr.rel (%p161_p10) target bundleno = 339 (0x153), region = 40 }
  0x11   : > { %p936_p12 = pnand %p943_p9, %p935_p11 }
  0x13   : > { %938 = dma.hbm_to_vmem [thread:$0]  (!%p936_p12), %s178_s7, 4096, %s180_s9, [#allocation3], %s1082_s10, %s1082_s10, %s1083_s11  }
  0x15   : > { %1058 = dma.done.wait (%p943_p9), [#allocation3], 4096  }
  0x16   : > { %1060 = vsyncadd (%p943_p9), [#allocation3], 4294963200  ;;  %s725_s12 = sshll.u32 %s1137_s22, 2  ;;  %v745_v0 = vld [vmem:[%s1260_s1 + $0x10] sm:$0xf]  ;;  %vm288_vm0 = vcmask 261120  }
  0x17   : > { %p237_p13 = scmp.lt.s32.totalorder %s725_s12, 7  ;;  %v894_v1 = vld [vmem:[%s1260_s1 + $0x14] sm:$0xf0]  ;;  %v893_v2 = vld [vmem:[%s1260_s1 + $0x14] sm:$0xf]  ;;  %s233_s30 = sand.u32 1, %s1071_s19  }
  0x18   : > { %v746_v3 = vor.u32 %v894_v1, %v745_v0  ;;  %v747_v4 = vld [vmem:[%s1260_s1 + $0x18] sm:$0xf0]  ;;  %v737_v5 = vld [vmem:[%s1260_s1] sm:$0xf]  ;;  %v892_v6 = vld [vmem:[%s1260_s1 + $0x4] sm:$0xf0] }
  0x19   : > { %s1272_s12 = smov (!%p237_p13, %s725_s12), 7  ;;  %v750_v7 = vor.u32 %v893_v2, %v747_v4  ;;  %v891_v8 = vld [vmem:[%s1260_s1 + $0x4] sm:$0xf]  ;;  %v739_v9 = vld [vmem:[%s1260_s1 + $0x8] sm:$0xf0]  ;;  %v738_v10 = vor.u32 %v892_v6, %v737_v5  ;;  %s724_s6 = sshll.u32 %s233_s30, 5 }
  0x1a   : > { %s726_s13 = sshll.u32 %s1272_s12, 2  ;;  %301 = vmatpush.bf16.msra.mxu0 %v746_v3  ;;  %v813_v11 = vld [vmem:[#allocation2 + $0x70] sm:$0xf]  ;;  %v910_v12 = vld [vmem:[#allocation2 + $0x74] sm:$0xf0]  ;;  %v742_v13 = vor.u32 %v891_v8, %v739_v9  ;;  %s1219_s7 = scalar_lea.vmem [#allocation5], %s724_s6 }
  0x1b   : > { %s1196_s12 = scalar_lea.vmem %s1259_s0, %s726_s13  ;;  %320 = vmatpush.bf16.msra.mxu1 %v750_v7  ;;  %v814_v15 = vor.u32 %v910_v12, %v813_v11  ;;  %v877_v16 = vld [vmem:[#allocation2 + $0xf0] sm:$0xf]  ;;  %v926_v17 = vld [vmem:[#allocation2 + $0xf4] sm:$0xf0]  ;;  %v909_v18 = vld [vmem:[#allocation2 + $0x74] sm:$0xf] }
  0x1c   : > { %v889_v14 = vld [vmem:[%s1196_s12] sm:$0xff]  ;;  %v878_v19 = vor.u32 %v926_v17, %v877_v16  ;;  %v815_v20 = vld [vmem:[#allocation2 + $0x78] sm:$0xf0]  ;;  %v925_v21 = vld [vmem:[#allocation2 + $0xf4] sm:$0xf]  ;;  %s928_s8 = sshll.u32 %s1137_s22, 5 }
  0x1d   : > { %v879_v22 = vld [vmem:[#allocation2 + $0xf8] sm:$0xf0]  ;;  %543 = vmatpush.bf16.msra.mxu2 %v814_v15  ;;  %v818_v23 = vor.u32 %v909_v18, %v815_v20  ;;  %v805_v25 = vld [vmem:[#allocation2 + $0x60] sm:$0xf]  ;;  %v908_v26 = vld [vmem:[#allocation2 + $0x64] sm:$0xf0]  ;;  %s640_s11 = scalar_lea.hbm %s1264_s5, %s928_s8 }
  0x1e   : > { %v882_v24 = vor.u32 %v925_v21, %v879_v22  ;;  %v869_v27 = vld [vmem:[#allocation2 + $0xe0] sm:$0xf]  ;;  %302 = vmatpush.bf16.msra.mxu0 %v738_v10  ;;  %562 = vmatpush.bf16.msra.mxu3 %v878_v19  ;;  %v806_v28 = vor.u32 %v908_v26, %v805_v25  ;;  %v924_v29 = vld [vmem:[#allocation2 + $0xe4] sm:$0xf0]  ;;  %v907_v30 = vld [vmem:[#allocation2 + $0x64] sm:$0xf] }
  0x1f   : > { %v807_v31 = vld [vmem:[#allocation2 + $0x68] sm:$0xf0]  ;;  %321 = vmatpush.bf16.msra.mxu1 %v742_v13  ;;  %v870_v32 = vor.u32 %v924_v29, %v869_v27  ;;  %v923_v34 = vld [vmem:[#allocation2 + $0xe4] sm:$0xf]  ;;  %v797_v36 = vld [vmem:[#allocation2 + $0x50] sm:$0xf] }
  0x20   : > { %v810_v33 = vor.u32 %v907_v30, %v807_v31  ;;  %v871_v35 = vld [vmem:[#allocation2 + $0xe8] sm:$0xf0]  ;;  %v906_v38 = vld [vmem:[#allocation2 + $0x54] sm:$0xf0]  ;;  %v861_v39 = vld [vmem:[#allocation2 + $0xd0] sm:$0xf] }
  0x21   : > { %v874_v37 = vor.u32 %v923_v34, %v871_v35  ;;  %v922_v40 = vld [vmem:[#allocation2 + $0xd4] sm:$0xf0]  ;;  %751 = vmatmul.msk.bf16.vlgmr.msra.gmra.mxu0 %vm288_vm0, %v889_v14  ;;  %544 = vmatpush.bf16.msra.mxu2 %v806_v28  ;;  %v798_v41 = vor.u32 %v906_v38, %v797_v36  ;;  %v905_v42 = vld [vmem:[#allocation2 + $0x54] sm:$0xf]  ;;  %v799_v43 = vld [vmem:[#allocation2 + $0x58] sm:$0xf0] }
  0x22   : > { %581 = vmatpush.bf16.msrb.mxu0 %v818_v23  ;;  %v921_v44 = vld [vmem:[#allocation2 + $0xd4] sm:$0xf]  ;;  %753 = vmatmul.msk.bf16.vlgmr.msra.gmra.mxu1 %vm288_vm0, %v889_v14  ;;  %v862_v45 = vor.u32 %v922_v40, %v861_v39  ;;  %v863_v46 = vld [vmem:[#allocation2 + $0xd8] sm:$0xf0]  ;;  %v789_v47 = vld [vmem:[#allocation2 + $0x40] sm:$0xf]  ;;  %v802_v49 = vor.u32 %v905_v42, %v799_v43 }
  0x23   : > { %600 = vmatpush.bf16.msrb.mxu1 %v882_v24  ;;  %563 = vmatpush.bf16.msra.mxu3 %v870_v32  ;;  %v904_v48 = vld [vmem:[#allocation2 + $0x44] sm:$0xf0]  ;;  %v853_v50 = vld [vmem:[#allocation2 + $0xc0] sm:$0xf]  ;;  %v866_v52 = vor.u32 %v921_v44, %v863_v46  ;;  %v903_v53 = vld [vmem:[#allocation2 + $0x44] sm:$0xf] }
  0x24   : > { %v920_v51 = vld [vmem:[#allocation2 + $0xc4] sm:$0xf0]  ;;  %v791_v54 = vld [vmem:[#allocation2 + $0x48] sm:$0xf0]  ;;  %v790_v55 = vor.u32 %v904_v48, %v789_v47  ;;  %v919_v56 = vld [vmem:[#allocation2 + $0xc4] sm:$0xf] }
  0x25   : > { %545 = vmatpush.bf16.msra.mxu2 %v798_v41  ;;  %v855_v57 = vld [vmem:[#allocation2 + $0xc8] sm:$0xf0]  ;;  %v854_v58 = vor.u32 %v920_v51, %v853_v50  ;;  %v794_v59 = vor.u32 %v903_v53, %v791_v54  ;;  %v781_v62 = vld [vmem:[#allocation2 + $0x30] sm:$0xf]  ;;  %v902_v63 = vld [vmem:[#allocation2 + $0x34] sm:$0xf0] }
  0x26   : > { %582 = vmatpush.bf16.msrb.mxu0 %v810_v33  ;;  %v858_v60 = vor.u32 %v919_v56, %v855_v57  ;;  %v890_v61 = vld [vmem:[%s1196_s12 + $0x8] sm:$0xff]  ;;  %v845_v0 = vld [vmem:[#allocation2 + $0xb0] sm:$0xf]  ;;  %v782_v1 = vor.u32 %v902_v63, %v781_v62  ;;  %v918_v2 = vld [vmem:[#allocation2 + $0xb4] sm:$0xf0]  ;;  %s641_s12 = sshll.u32 %s1219_s7, 4  ;;  %s642_s12 = int_to_ptr.vmem [resolvable:$true] %s641_s12 }
  0x27   : > { %601 = vmatpush.bf16.msrb.mxu1 %v874_v37  ;;  %564 = vmatpush.bf16.msra.mxu3 %v862_v45  ;;  %v901_v3 = vld [vmem:[#allocation2 + $0x34] sm:$0xf]  ;;  %v783_v4 = vld [vmem:[#allocation2 + $0x38] sm:$0xf0]  ;;  %v846_v5 = vor.u32 %v918_v2, %v845_v0  ;;  %v773_v10 = vld [vmem:[#allocation2 + $0x20] sm:$0xf] }
  0x28   : > { %v786_v6 = vor.u32 %v901_v3, %v783_v4  ;;  %v917_v7 = vld [vmem:[#allocation2 + $0xb4] sm:$0xf]  ;;  %v847_v8 = vld [vmem:[#allocation2 + $0xb8] sm:$0xf0]  ;;  %v900_v11 = vld [vmem:[#allocation2 + $0x24] sm:$0xf0] }
  0x29   : > { %546 = vmatpush.bf16.msra.mxu2 %v790_v55  ;;  %v850_v9 = vor.u32 %v917_v7, %v847_v8  ;;  %v774_v12 = vor.u32 %v900_v11, %v773_v10  ;;  %v837_v13 = vld [vmem:[#allocation2 + $0xa0] sm:$0xf]  ;;  %v916_v14 = vld [vmem:[#allocation2 + $0xa4] sm:$0xf0]  ;;  %v899_v15 = vld [vmem:[#allocation2 + $0x24] sm:$0xf] }
  0x2a   : > { %583 = vmatpush.bf16.msrb.mxu0 %v802_v49  ;;  %v838_v16 = vor.u32 %v916_v14, %v837_v13  ;;  %v775_v17 = vld [vmem:[#allocation2 + $0x28] sm:$0xf0]  ;;  %v915_v18 = vld [vmem:[#allocation2 + $0xa4] sm:$0xf]  ;;  %v765_v22 = vld [vmem:[#allocation2 + $0x10] sm:$0xf] }
  0x2b   : > { %602 = vmatpush.bf16.msrb.mxu1 %v866_v52  ;;  %565 = vmatpush.bf16.msra.mxu3 %v854_v58  ;;  %v839_v19 = vld [vmem:[#allocation2 + $0xa8] sm:$0xf0]  ;;  %v778_v20 = vor.u32 %v899_v15, %v775_v17  ;;  %v898_v23 = vld [vmem:[#allocation2 + $0x14] sm:$0xf0]  ;;  %v829_v24 = vld [vmem:[#allocation2 + $0x90] sm:$0xf] }
  0x2c   : > { %v842_v21 = vor.u32 %v915_v18, %v839_v19  ;;  %v766_v25 = vor.u32 %v898_v23, %v765_v22  ;;  %v914_v26 = vld [vmem:[#allocation2 + $0x94] sm:$0xf0]  ;;  %v897_v27 = vld [vmem:[#allocation2 + $0x14] sm:$0xf]  ;;  %v767_v28 = vld [vmem:[#allocation2 + $0x18] sm:$0xf0] }
  0x2d   : > { %547 = vmatpush.bf16.msra.mxu2 %v782_v1  ;;  %v830_v29 = vor.u32 %v914_v26, %v829_v24  ;;  %v770_v30 = vor.u32 %v897_v27, %v767_v28  ;;  %v913_v31 = vld [vmem:[#allocation2 + $0x94] sm:$0xf]  ;;  %v831_v32 = vld [vmem:[#allocation2 + $0x98] sm:$0xf0]  ;;  %v757_v34 = vld [vmem:[#allocation2] sm:$0xf] }
  0x2e   : > { %584 = vmatpush.bf16.msrb.mxu0 %v794_v59  ;;  %v834_v33 = vor.u32 %v913_v31, %v831_v32  ;;  %v896_v35 = vld [vmem:[#allocation2 + $0x4] sm:$0xf0]  ;;  %v821_v36 = vld [vmem:[#allocation2 + $0x80] sm:$0xf]  ;;  %v895_v39 = vld [vmem:[#allocation2 + $0x4] sm:$0xf] }
  0x2f   : > { %603 = vmatpush.bf16.msrb.mxu1 %v858_v60  ;;  %566 = vmatpush.bf16.msra.mxu3 %v846_v5  ;;  %v758_v37 = vor.u32 %v896_v35, %v757_v34  ;;  %v912_v38 = vld [vmem:[#allocation2 + $0x84] sm:$0xf0]  ;;  %v759_v40 = vld [vmem:[#allocation2 + $0x8] sm:$0xf0]  ;;  %v911_v43 = vld [vmem:[#allocation2 + $0x84] sm:$0xf] }
  0x30   : > { %v822_v41 = vor.u32 %v912_v38, %v821_v36  ;;  %v762_v42 = vor.u32 %v895_v39, %v759_v40  ;;  %v823_v44 = vld [vmem:[#allocation2 + $0x88] sm:$0xf0]  ;;  %v252_v46 = vld [vmem:[%s1261_s2] sm:$0x3]  ;;  %s643_s14 = sshll.u32 %s640_s11, 4  ;;  %s628_s22 = scalar_lea.sflag [#allocation4], %s233_s30  ;;  %s644_s14 = int_to_ptr.hbm [resolvable:$true] %s643_s14 }
  0x31   : > { %752 = vmatmul.msk.bf16.gmra.mxu0 %vm288_vm0, %v890_v61  ;;  %548 = vmatpush.bf16.msra.mxu2 %v774_v12  ;;  %v826_v45 = vor.u32 %v911_v43, %v823_v44  ;;  %v254_v49 = vperm.slane %v252_v46, 0  ;;  %v255_v50 = vperm.slane %v252_v46, 1  ;;  %v377_v13 = vld [vmem:[%s1263_s4] sm:$0x3]  ;;  %s1027_s15 = sshra.s32 %s644_s14, 4  ;;  %s1033_s23 = scalar_lea.hbm %s1264_s5, 64  ;;  %s1028_s15 = int_to_ptr.hbm [resolvable:$true] %s1027_s15 }
  0x32   : > { %754 = vmatmul.msk.bf16.gmra.mxu1 %vm288_vm0, %v890_v61  ;;  %585 = vmatpush.bf16.msrb.mxu0 %v786_v6  ;;  %v380_v15 = vperm.slane %v377_v13, 1  ;;  %v379_v17 = vperm.slane %v377_v13, 0  ;;  %s1029_s16 = scalar_lea.hbm %s1028_s15, 32  ;;  %p1034_p3 = scmp.lt.s32.totalorder %s1028_s15, %s1264_s5 }
  0x33   : > { %604 = vmatpush.bf16.msrb.mxu1 %v850_v9  ;;  %567 = vmatpush.bf16.msra.mxu3 %v838_v16  ;;  %p1030_p0 = scmp.ne.s32.totalorder %s1028_s15, %s1029_s16  ;;  %p1035_p4 = scmp.lt.s32.totalorder %s1033_s23, %s1029_s16 }
  0x35   : > { %549 = vmatpush.bf16.msra.mxu2 %v766_v25  ;;  %p1031_p1 = pnand %p1030_p0, %p1154_p5  ;;  %p1036_p7 = por %p1035_p4, %p1034_p3 }
  0x36   : > { %586 = vmatpush.bf16.msrb.mxu0 %v778_v20 }
  0x37   : > { %605 = vmatpush.bf16.msrb.mxu1 %v842_v21  ;;  %568 = vmatpush.bf16.msra.mxu3 %v830_v29  ;;  %p1032_p2 = pneg %p1031_p1 }
  0x39   : > { %550 = vmatpush.bf16.msra.mxu2 %v758_v37  ;;  %p1037_p8 = pnand %p1036_p7, %p1032_p2 }
  0x3a   : > { %587 = vmatpush.bf16.msrb.mxu0 %v770_v30 }
  0x3b   : > { %606 = vmatpush.bf16.msrb.mxu1 %v834_v33  ;;  %569 = vmatpush.bf16.msra.mxu3 %v822_v41 }
  0x3e   : > { %588 = vmatpush.bf16.msrb.mxu0 %v762_v42 }
  0x3f   : > { %607 = vmatpush.bf16.msrb.mxu1 %v826_v45 }
  0x9e   : > { %v304_v47 = vpop.f32.mrf.mxu0 }
  0x9f   : > { %v323_v48 = vpop.f32.mrf.mxu1  ;;  %v305_v51 = vadd.f32 %v304_v47, %v254_v49 }
  0xa0   : > { %v324_v52 = vadd.f32 %v323_v48, %v255_v50 }
  0xa1   : > { %v333_v57 = vmax.f32 %v305_v51, 0.0 }
  0xa2   : > { %v334_v59 = vmax.f32 %v324_v52, 0.0 }
  0xa6   : > { %v306_v53 = vpop.f32.mrf.mxu0 }
  0xa7   : > { %v307_v54 = vadd.f32 %v306_v53, %v254_v49  ;;  %v325_v55 = vpop.f32.mrf.mxu1 }
  0xa8   : > { %v326_v56 = vadd.f32 %v325_v55, %v255_v50 }
  0xa9   : > { %v335_v58 = vmax.f32 %v307_v54, 0.0 }
  0xaa   : > { %v336_v60 = vmax.f32 %v326_v56, 0.0 }
  0xab   : > { %v341_v61 = vpack.c.bf16 %v335_v58, %v333_v57 }
  0xac   : > { %v342_v62 = vpack.c.bf16 %v336_v60, %v334_v59 }
  0xad   : > { %551 = vmatmul.bf16.vlgmr.msra.gmra.mxu2 %v341_v61  ;;  %589 = vmatmul.bf16.vlgmr.msrb.gmra.mxu0 %v341_v61 }
  0xae   : > { %570 = vmatmul.bf16.vlgmr.msra.gmra.mxu3 %v342_v62  ;;  %608 = vmatmul.bf16.vlgmr.msrb.gmra.mxu1 %v342_v62  ;;  %v309_v63 = vpop.f32.mrf.mxu0 }
  0xaf   : > { %v328_v0 = vpop.f32.mrf.mxu1  ;;  %v310_v1 = vadd.f32 %v309_v63, %v254_v49 }
  0xb0   : > { %v329_v2 = vadd.f32 %v328_v0, %v255_v50 }
  0xb1   : > { %v337_v7 = vmax.f32 %v310_v1, 0.0 }
  0xb2   : > { %v338_v9 = vmax.f32 %v329_v2, 0.0 }
  0xb6   : > { %v311_v3 = vpop.f32.mrf.mxu0 }
  0xb7   : > { %v312_v4 = vadd.f32 %v311_v3, %v254_v49  ;;  %v330_v5 = vpop.f32.mrf.mxu1 }
  0xb8   : > { %v331_v6 = vadd.f32 %v330_v5, %v255_v50 }
  0xb9   : > { %v339_v8 = vmax.f32 %v312_v4, 0.0 }
  0xba   : > { %v340_v10 = vmax.f32 %v331_v6, 0.0 }
  0xbb   : > { %v343_v11 = vpack.c.bf16 %v339_v8, %v337_v7 }
  0xbc   : > { %v344_v12 = vpack.c.bf16 %v340_v10, %v338_v9 }
  0xbd   : > { %556 = vmatmul.bf16.gmra.mxu2 %v343_v11  ;;  %594 = vmatmul.bf16.gmra.mxu0 %v343_v11 }
  0xbe   : > { %575 = vmatmul.bf16.gmra.mxu3 %v344_v12  ;;  %613 = vmatmul.bf16.gmra.mxu1 %v344_v12 }
 0x12a   : > { %v590_v14 = vpop.f32.mrf.mxu0 }
 0x12b   : > { %v609_v16 = vpop.f32.mrf.mxu1  ;;  %v591_v18 = vadd.f32 %v590_v14, %v380_v15 }
 0x12d   : > { %v610_v23 = vadd.f32 %v609_v16, %v591_v18 }
 0x130   : > { %v552_v19 = vpop.f32.mrf.mxu2 }
 0x131   : > { %v553_v20 = vadd.f32 %v552_v19, %v379_v17  ;;  %v571_v21 = vpop.f32.mrf.mxu3 }
 0x132   : > { %v592_v22 = vpop.f32.mrf.mxu0 }
 0x133   : > { %v572_v24 = vadd.f32 %v571_v21, %v553_v20  ;;  %v611_v26 = vpop.f32.mrf.mxu1  ;;  %v593_v27 = vadd.f32 %v592_v22, %v380_v15 }
 0x135   : > { %v619_v25 = vpack.c.bf16 %v610_v23, %v572_v24  ;;  %v612_v32 = vadd.f32 %v611_v26, %v593_v27 }
 0x137   : > { %623 = vst [vmem:[%s1219_s7] sm:$0xff] %v619_v25 }
 0x138   : > { %v554_v28 = vpop.f32.mrf.mxu2 }
 0x139   : > { %v555_v29 = vadd.f32 %v554_v28, %v379_v17  ;;  %v573_v30 = vpop.f32.mrf.mxu3 }
 0x13a   : > { %v595_v31 = vpop.f32.mrf.mxu0 }
 0x13b   : > { %v574_v33 = vadd.f32 %v573_v30, %v555_v29  ;;  %v596_v35 = vadd.f32 %v595_v31, %v380_v15  ;;  %v614_v36 = vpop.f32.mrf.mxu1 }
 0x13d   : > { %v620_v34 = vpack.c.bf16 %v612_v32, %v574_v33  ;;  %v615_v40 = vadd.f32 %v614_v36, %v596_v35 }
 0x13f   : > { %624 = vst [vmem:[%s1219_s7 + $0x8] sm:$0xff] %v620_v34 }
 0x140   : > { %v557_v37 = vpop.f32.mrf.mxu2 }
 0x141   : > { %v558_v38 = vadd.f32 %v557_v37, %v379_v17  ;;  %v576_v39 = vpop.f32.mrf.mxu3 }
 0x142   : > { %v597_v42 = vpop.f32.mrf.mxu0 }
 0x143   : > { %v577_v41 = vadd.f32 %v576_v39, %v558_v38  ;;  %v598_v44 = vadd.f32 %v597_v42, %v380_v15  ;;  %v616_v47 = vpop.f32.mrf.mxu1 }
 0x145   : > { %v621_v43 = vpack.c.bf16 %v615_v40, %v577_v41  ;;  %v617_v49 = vadd.f32 %v616_v47, %v598_v44 }
 0x147   : > { %625 = vst [vmem:[%s1219_s7 + $0x10] sm:$0xff] %v621_v43 }
 0x148   : > { %v559_v45 = vpop.f32.mrf.mxu2 }
 0x149   : > { %v560_v46 = vadd.f32 %v559_v45, %v379_v17  ;;  %v578_v48 = vpop.f32.mrf.mxu3 }
 0x14b   : > { %v579_v50 = vadd.f32 %v578_v48, %v560_v46 }
 0x14d   : > { %v622_v51 = vpack.c.bf16 %v617_v49, %v579_v50 }
 0x14f   : > { %626 = vst [vmem:[%s1219_s7 + $0x18] sm:$0xff] %v622_v51 }
 0x150   : > { %1040 = shalt.err (!%p1037_p8)
}
 0x151   : > { %s1084_s30 = smov 128   ;;  %s1085_s6 = smov 8  }
 0x152   : > { %933 = dma.vmem_to_hbm [thread:$0]  (%p1154_p5), %s642_s12, 512, %s644_s14, %s628_s22, %s1084_s30, %s1084_s30, %s1085_s6  }
 0x153 PF: > { %p945_p9 = scmp.ge.s32.totalorder %s1079_s21, 2  ;;  %s658_s7 = sand.u32 1, %s1067_s18  }
 0x154   : > { %s659_s8 = scalar_lea.sflag [#allocation4], %s658_s7 }
 0x155   : > { %p940_p10 = pnand %p945_p9, %p1158_p6 }
 0x157   : > { %p941_p11 = pneg %p940_p10 }
 0x159   : > { %1062 = dma.done.wait (%p941_p11), %s659_s8, 512  }
 0x15a   : > { %1064 = vsyncadd (%p941_p11), %s659_s8, 4294966784  ;;  %p16_p12 = scmp.ge.s32.totalorder %s1141_s24, 4   ;;  %s1267_s18 = smov %s1071_s19 }
 0x15b   : > { %s1268_s19 = smov %s1075_s20  ;;  %s1269_s20 = smov %s1152_s27 }
 0x15c   : > { %s1270_s21 = smov %s1141_s24  ;;  %18 = sbr.rel (!%p16_p12) target bundleno = 4 (0x4), region = 80 }
 0x161   :  { %665 = vsyncpa [#allocation3], 1 }
 0x162   :  { %667 = vsyncpa [#allocation3 + $0x1], 1 }
 0x163   :  { %668 = vsyncpa [#allocation4], 1 }
 0x164   :  { %670 = vsyncpa [#allocation4 + $0x1], 1 }

</bundles_post_ra>
